<compile_context>
chip_gen: v7x
topology: tpu7x:2x2x1
jax: 0.10.0
libtpu: 0.0.40
codegen_flags: <defaults>
</compile_context>

<pallas_src>
import functools

import numpy as np
import jax
import jax.numpy as jnp
from jax.experimental import pallas as pl
from jax.experimental.pallas import tpu as pltpu

LANE = 128


def _round_up(n, m):
    return ((n + m - 1) // m) * m


# ---------------------------------------------------------------------------
# Fused kernel: layer 1 as partial dots (pre | post | str_len), then
# [Linear -> ReLU]* -> Linear, everything resident in VMEM / vregs.
#   pre_ref:  (B, S*E)  f32
#   post_ref: (B, S*E)  f32
#   len_ref:  (B, 1)    f32
#   w_ref:    (L, P, P) bf16   (W1 row-permuted: [pre rows | post rows | len row])
#   b_ref:    (L, 1, P) f32
#   o_ref:    (B, P)    f32
# ---------------------------------------------------------------------------
def _fused_mlp_kernel(pre_ref, post_ref, len_ref, w_ref, b_ref, o_ref):
    se = pre_ref.shape[1]          # flattened pre (== post) feature width
    n_layers = w_ref.shape[0]

    # ---- layer 1: partial dots, no concat / pad of the activation needed ----
    pre = pre_ref[...].astype(jnp.bfloat16)
    post = post_ref[...].astype(jnp.bfloat16)
    h = jnp.dot(pre, w_ref[0, 0:se, :], preferred_element_type=jnp.float32)
    h = h + jnp.dot(post, w_ref[0, se:2 * se, :],
                    preferred_element_type=jnp.float32)
    # str_len contribution: rank-1 update on the VPU, kept in f32 (v5e-safe).
    # str_len is rounded to bf16 (like the matmul operands) for exact parity
    # with a uniformly-bf16 reference.
    len_bf = len_ref[...].astype(jnp.bfloat16).astype(jnp.float32)      # (B,1)
    w_len = w_ref[0, 2 * se:2 * se + 1, :].astype(jnp.float32)          # (1,P)
    h = h + len_bf * w_len
    h = h + b_ref[0]
    h = jnp.maximum(h, 0.0)        # ReLU; Dropout(eval) == identity

    # ---- remaining layers (unrolled at trace time) ----
    for i in range(1, n_layers):
        h = jnp.dot(h.astype(jnp.bfloat16), w_ref[i],
                    preferred_element_type=jnp.float32) + b_ref[i]
        if i < n_layers - 1:
            h = jnp.maximum(h, 0.0)

    o_ref[...] = h


# ---------------------------------------------------------------------------
# Parameter init (PyTorch nn.Linear-style). W stored (in, out) so y = x @ W + b.
# ---------------------------------------------------------------------------
def init_densenet_params(key, input_size, layer_sizes, output_size):
    dims = [input_size] + list(layer_sizes) + [output_size]
    params = []
    for i in range(len(dims) - 1):
        key, kw, kb = jax.random.split(key, 3)
        fan_in, fan_out = dims[i], dims[i + 1]
        bound = 1.0 / (fan_in ** 0.5)
        w = jax.random.uniform(kw, (fan_in, fan_out), jnp.float32, -bound, bound)
        b = jax.random.uniform(kb, (fan_out,), jnp.float32, -bound, bound)
        params.append((w, b))
    return params


def pack_params_for_kernel(params, seq, emb, lane=LANE):
    """One-time packing:
       * permute W1 rows from torch's interleaved concat order
         [pre_0, post_0, pre_1, post_1, ..., str_len] to
         [all pre rows | all post rows | str_len row],
       * zero-pad every W to (P, P) and every b to (1, P),
       * stack -> w_stack (L,P,P) bf16, b_stack (L,1,P) f32."""
    se = seq * emb
    dims = [params[0][0].shape[0]] + [w.shape[1] for w, _ in params]
    p = _round_up(max(dims), lane)

    w1, _ = params[0]
    assert w1.shape[0] == 2 * se + 1
    pre_rows = (np.arange(seq)[:, None] * (2 * emb) + np.arange(emb)[None, :]).reshape(-1)
    post_rows = pre_rows + emb
    perm = np.concatenate([pre_rows, post_rows, np.array([2 * se])])

    w_list = [jnp.asarray(w1)[perm, :]] + [w for w, _ in params[1:]]
    b_list = [b for _, b in params]

    w_stack = jnp.stack([
        jnp.pad(w, ((0, p - w.shape[0]), (0, p - w.shape[1]))) for w in w_list
    ]).astype(jnp.bfloat16)
    b_stack = jnp.stack([
        jnp.pad(b.reshape(1, -1), ((0, 0), (0, p - b.shape[0]))) for b in b_list
    ]).astype(jnp.float32)
    return w_stack, b_stack


# ---------------------------------------------------------------------------
# Full ConcatPredictorSTRLen forward: one pallas_call + a final slice.
# ---------------------------------------------------------------------------
def concat_predictor_strlen_forward(kernel_params, pre_embed, post_embed,
                                    str_len, *, output_size):
    w_stack, b_stack = kernel_params
    batch, seq, emb = pre_embed.shape
    p = w_stack.shape[-1]
    n_layers = w_stack.shape[0]

    # Contiguous reshapes only (layout no-ops); concat/flatten/pad all happen
    # inside the kernel via the row-permuted W1 partial dots.
    pre_flat = pre_embed.reshape(batch, seq * emb)
    post_flat = post_embed.reshape(batch, seq * emb)
    len_col = str_len.reshape(batch, 1)

    flops = 2 * batch * p * p * n_layers
    bytes_accessed = (w_stack.size * 2 + b_stack.size * 4
                      + (pre_flat.size + post_flat.size + len_col.size) * 4
                      + batch * p * 4)

    vmem_spec = pl.BlockSpec(memory_space=pltpu.MemorySpace.VMEM)
    out_p = pl.pallas_call(
        _fused_mlp_kernel,
        out_shape=jax.ShapeDtypeStruct((batch, p), jnp.float32),
        in_specs=[vmem_spec] * 5,
        out_specs=vmem_spec,
        cost_estimate=pl.CostEstimate(flops=flops, transcendentals=0,
                                      bytes_accessed=bytes_accessed),
    )(pre_flat, post_flat, len_col, w_stack, b_stack)
    return out_p[:, :output_size]


# ---------------------------------------------------------------------------
# References.
# ---------------------------------------------------------------------------
def reference_f32(params, pre_embed, post_embed, str_len):
    """Pure f32 reference == the PyTorch module semantics."""
    batch = pre_embed.shape[0]
    x = jnp.concatenate([pre_embed, post_embed], axis=-1).reshape(batch, -1)
    x = jnp.concatenate([x, str_len.reshape(batch, -1)], axis=-1)
    n = len(params)
    for i, (w, b) in enumerate(params):
        x = x @ w + b
        if i < n - 1:
            x = jnp.maximum(x, 0.0)
    return x


def reference_bf16_matmul(params, pre_embed, post_embed, str_len):
    """Same forward, matmul operands rounded to bf16 (matching the kernel's
    MXU numerics); accumulation / bias / ReLU stay in f32."""
    batch = pre_embed.shape[0]
    x = jnp.concatenate([pre_embed, post_embed], axis=-1).reshape(batch, -1)
    x = jnp.concatenate([x, str_len.reshape(batch, -1)], axis=-1)
    n = len(params)
    for i, (w, b) in enumerate(params):
        x = jnp.dot(x.astype(jnp.bfloat16), w.astype(jnp.bfloat16),
                    preferred_element_type=jnp.float32) + b
        if i < n - 1:
            x = jnp.maximum(x, 0.0)
    return x


if __name__ == "__main__":
    # Shapes consistent with the module: pre/post embeds (B, S, E), str_len (B,),
    # predictor = DenseNet(input=S*2E+1=65, hidden=[64, 32], out=8).
    batch = 8
    seq = 4
    emb = 8
    layer_sizes = [64, 32]
    output_size = 8
    input_size = seq * 2 * emb + 1

    key = jax.random.PRNGKey(0)
    key, k1, k2, k3 = jax.random.split(key, 4)
    pre_embed = jax.random.normal(k1, (batch, seq, emb), jnp.float32)
    post_embed = jax.random.normal(k2, (batch, seq, emb), jnp.float32)
    str_len = jax.random.uniform(k3, (batch,), jnp.float32, 0.0, 10.0)

    params = init_densenet_params(key, input_size, layer_sizes, output_size)
    kernel_params = pack_params_for_kernel(params, seq, emb)

    fwd = jax.jit(functools.partial(concat_predictor_strlen_forward,
                                    output_size=output_size))
    out = jax.block_until_ready(fwd(kernel_params, pre_embed, post_embed, str_len))

    assert out.shape == (batch, output_size)

    # Tight check vs. a reference with identical (bf16-operand) matmul numerics:
    # this fully validates the in-kernel concat/flatten/str_len plumbing.
    ref_bf16 = reference_bf16_matmul(params, pre_embed, post_embed, str_len)
    assert jnp.allclose(out, ref_bf16, atol=1e-4, rtol=1e-3), \
        "mismatch vs bf16-matched reference"

    # Loose sanity check vs. the pure-f32 module semantics (differences are
    # bounded by bf16 operand rounding, ~1e-2).
    ref_f32 = reference_f32(params, pre_embed, post_embed, str_len)
    assert jnp.allclose(out, ref_f32, atol=1e-1, rtol=1e-1), \
        "mismatch vs f32 reference"

    print("KERNEL_OK")
</pallas_src>

<mosaic_0001>
module attributes {stable_mosaic.version = 11 : i64} {
  func.func @_fused_mlp_kernel(%arg0: memref<8x32xf32, #tpu.memory_space<vmem>>, %arg1: memref<8x32xf32, #tpu.memory_space<vmem>>, %arg2: memref<8x1xf32, #tpu.memory_space<vmem>>, %arg3: memref<3x128x128xbf16, #tpu.memory_space<vmem>>, %arg4: memref<3x1x128xf32, #tpu.memory_space<vmem>>, %arg5: memref<8x128xf32, #tpu.memory_space<vmem>>) attributes {dimension_semantics = [], scalar_prefetch = 0 : i64, scratch_operands = 0 : i64, tpu.core_type = #tpu.core_type<tc>} {
    %c0 = arith.constant 0 : index
    %c0_0 = arith.constant 0 : index
    %0 = vector.load %arg0[%c0, %c0_0] : memref<8x32xf32, #tpu.memory_space<vmem>>, vector<8x32xf32>
    %1 = arith.truncf %0 : vector<8x32xf32> to vector<8x32xbf16>
    %c0_1 = arith.constant 0 : index
    %c0_2 = arith.constant 0 : index
    %2 = vector.load %arg1[%c0_1, %c0_2] : memref<8x32xf32, #tpu.memory_space<vmem>>, vector<8x32xf32>
    %3 = arith.truncf %2 : vector<8x32xf32> to vector<8x32xbf16>
    %c0_3 = arith.constant 0 : index
    %c0_4 = arith.constant 0 : index
    %c0_5 = arith.constant 0 : index
    %4 = vector.load %arg3[%c0_3, %c0_4, %c0_5] : memref<3x128x128xbf16, #tpu.memory_space<vmem>>, vector<1x32x128xbf16>
    %5 = vector.shape_cast %4 : vector<1x32x128xbf16> to vector<32x128xbf16>
    %cst = arith.constant dense<0.000000e+00> : vector<8x128xf32>
    %6 = tpu.matmul %1, %5, %cst {dimension_numbers = #tpu.dot_dimension_numbers<[1], [0], [0], [1], [0, 0, 1, 1], [], []>} : vector<8x32xbf16>, vector<32x128xbf16>, vector<8x128xf32> -> vector<8x128xf32>
    %c0_6 = arith.constant 0 : index
    %c32 = arith.constant 32 : index
    %c0_7 = arith.constant 0 : index
    %7 = vector.load %arg3[%c0_6, %c32, %c0_7] : memref<3x128x128xbf16, #tpu.memory_space<vmem>>, vector<1x32x128xbf16>
    %8 = vector.shape_cast %7 : vector<1x32x128xbf16> to vector<32x128xbf16>
    %cst_8 = arith.constant dense<0.000000e+00> : vector<8x128xf32>
    %9 = tpu.matmul %3, %8, %cst_8 {dimension_numbers = #tpu.dot_dimension_numbers<[1], [0], [0], [1], [0, 0, 1, 1], [], []>} : vector<8x32xbf16>, vector<32x128xbf16>, vector<8x128xf32> -> vector<8x128xf32>
    %10 = arith.addf %6, %9 : vector<8x128xf32>
    %c0_9 = arith.constant 0 : index
    %c0_10 = arith.constant 0 : index
    %11 = vector.load %arg2[%c0_9, %c0_10] : memref<8x1xf32, #tpu.memory_space<vmem>>, vector<8x1xf32>
    %12 = arith.truncf %11 : vector<8x1xf32> to vector<8x1xbf16>
    %13 = arith.extf %12 : vector<8x1xbf16> to vector<8x1xf32>
    %c0_11 = arith.constant 0 : index
    %c64 = arith.constant 64 : index
    %c0_12 = arith.constant 0 : index
    %14 = vector.load %arg3[%c0_11, %c64, %c0_12] : memref<3x128x128xbf16, #tpu.memory_space<vmem>>, vector<1x1x128xbf16>
    %15 = vector.shape_cast %14 : vector<1x1x128xbf16> to vector<1x128xbf16>
    %16 = arith.extf %15 : vector<1x128xbf16> to vector<1x128xf32>
    %17 = vector.broadcast %13 : vector<8x1xf32> to vector<8x128xf32>
    %18 = vector.broadcast %16 : vector<1x128xf32> to vector<8x128xf32>
    %19 = arith.mulf %17, %18 : vector<8x128xf32>
    %20 = arith.addf %10, %19 : vector<8x128xf32>
    %c0_13 = arith.constant 0 : index
    %c0_14 = arith.constant 0 : index
    %c0_15 = arith.constant 0 : index
    %21 = vector.load %arg4[%c0_13, %c0_14, %c0_15] : memref<3x1x128xf32, #tpu.memory_space<vmem>>, vector<1x1x128xf32>
    %22 = vector.shape_cast %21 : vector<1x1x128xf32> to vector<1x128xf32>
    %23 = vector.broadcast %22 : vector<1x128xf32> to vector<8x128xf32>
    %24 = arith.addf %20, %23 : vector<8x128xf32>
    %cst_16 = arith.constant 0.000000e+00 : f32
    %25 = vector.broadcast %cst_16 : f32 to vector<8x128xf32>
    %26 = arith.maximumf %24, %25 : vector<8x128xf32>
    %27 = arith.truncf %26 : vector<8x128xf32> to vector<8x128xbf16>
    %c1 = arith.constant 1 : index
    %c0_17 = arith.constant 0 : index
    %c0_18 = arith.constant 0 : index
    %28 = vector.load %arg3[%c1, %c0_17, %c0_18] : memref<3x128x128xbf16, #tpu.memory_space<vmem>>, vector<1x128x128xbf16>
    %29 = vector.shape_cast %28 : vector<1x128x128xbf16> to vector<128x128xbf16>
    %cst_19 = arith.constant dense<0.000000e+00> : vector<8x128xf32>
    %30 = tpu.matmul %27, %29, %cst_19 {dimension_numbers = #tpu.dot_dimension_numbers<[1], [0], [0], [1], [0, 0, 1, 1], [], []>} : vector<8x128xbf16>, vector<128x128xbf16>, vector<8x128xf32> -> vector<8x128xf32>
    %c1_20 = arith.constant 1 : index
    %c0_21 = arith.constant 0 : index
    %c0_22 = arith.constant 0 : index
    %31 = vector.load %arg4[%c1_20, %c0_21, %c0_22] : memref<3x1x128xf32, #tpu.memory_space<vmem>>, vector<1x1x128xf32>
    %32 = vector.shape_cast %31 : vector<1x1x128xf32> to vector<1x128xf32>
    %33 = vector.broadcast %32 : vector<1x128xf32> to vector<8x128xf32>
    %34 = arith.addf %30, %33 : vector<8x128xf32>
    %cst_23 = arith.constant 0.000000e+00 : f32
    %35 = vector.broadcast %cst_23 : f32 to vector<8x128xf32>
    %36 = arith.maximumf %34, %35 : vector<8x128xf32>
    %37 = arith.truncf %36 : vector<8x128xf32> to vector<8x128xbf16>
    %c2 = arith.constant 2 : index
    %c0_24 = arith.constant 0 : index
    %c0_25 = arith.constant 0 : index
    %38 = vector.load %arg3[%c2, %c0_24, %c0_25] : memref<3x128x128xbf16, #tpu.memory_space<vmem>>, vector<1x128x128xbf16>
    %39 = vector.shape_cast %38 : vector<1x128x128xbf16> to vector<128x128xbf16>
    %cst_26 = arith.constant dense<0.000000e+00> : vector<8x128xf32>
    %40 = tpu.matmul %37, %39, %cst_26 {dimension_numbers = #tpu.dot_dimension_numbers<[1], [0], [0], [1], [0, 0, 1, 1], [], []>} : vector<8x128xbf16>, vector<128x128xbf16>, vector<8x128xf32> -> vector<8x128xf32>
    %c2_27 = arith.constant 2 : index
    %c0_28 = arith.constant 0 : index
    %c0_29 = arith.constant 0 : index
    %41 = vector.load %arg4[%c2_27, %c0_28, %c0_29] : memref<3x1x128xf32, #tpu.memory_space<vmem>>, vector<1x1x128xf32>
    %42 = vector.shape_cast %41 : vector<1x1x128xf32> to vector<1x128xf32>
    %43 = vector.broadcast %42 : vector<1x128xf32> to vector<8x128xf32>
    %44 = arith.addf %40, %43 : vector<8x128xf32>
    %c0_30 = arith.constant 0 : index
    %c0_31 = arith.constant 0 : index
    %45 = vector.load %arg5[%c0_30, %c0_31] : memref<8x128xf32, #tpu.memory_space<vmem>>, vector<8x128xf32>
    tpu.vector_store %arg5[%c0_30, %c0_31], %44 {strides = array<i32>} : memref<8x128xf32, #tpu.memory_space<vmem>>, vector<8x128xf32>,
    return
  }
}

</mosaic_0001>

<bundles_post_ra>
// kernel: concat_predictor_strlen_forward.1
= control target key start
LH: loop header
LB: loop body
LE: loop exit
PB: predicated region body
PF: predicated region fallthrough
CT: control target
= control target key end

     0   :  { %10 = vsyncpa [#allocation3], 0  ;;  %s719_s0 = inlined_call_operand.vmem [shape: f32[8,32], index: 0, kind: input, shape index: {}]   ;;  %s720_s1 = inlined_call_operand.vmem [shape: f32[8,32], index: 1, kind: input, shape index: {}]   ;;  %s721_s2 = inlined_call_operand.vmem [shape: f32[8,1], index: 2, kind: input, shape index: {}]   ;;  %s722_s3 = inlined_call_operand.hbm [shape: bf16[3,128,128], index: 3, kind: input, shape index: {}]   ;;  %s723_s4 = inlined_call_operand.vmem [shape: f32[3,1,128], index: 4, kind: input, shape index: {}]   ;;  %s724_s5 = inlined_call_operand.hbm [shape: f32[8,128], index: 5, kind: output, shape index: {}]  }
   0x1   :  { %11 = vsyncpa [#allocation4], 0  ;;  %s612_s18 = smov [#allocation2]   ;;  %s564_s22 = scalar_lea.hbm %s722_s3, 3072 }
   0x2   :  { %s23_s19 = sshll.u32 %s612_s18, 4  ;;  %p565_p0 = scmp.ne.s32.totalorder %s722_s3, %s564_s22  ;;  %s24_s19 = int_to_ptr.vmem [resolvable:$true] %s23_s19 }
   0x3   :  { %p568_p1 = scmp.lt.u32.totalorder %s564_s22, %s722_s3 }
   0x5   :  { %p570_p2 = pnand %p568_p1, %p565_p0 }
   0x7   :  { %573 = shalt.err (!%p570_p2)
}
   0x8   :  { %s574_s27 = scalar_lea.vmem %s24_s19, 3072  ;;  %p579_p4 = scmp.lt.s32.totalorder %s24_s19, %s24_s19 }
   0x9   :  { %p575_p3 = scmp.ne.s32.totalorder %s24_s19, %s574_s27  ;;  %p580_p5 = scmp.lt.s32.totalorder %s574_s27, %s574_s27 }
   0xb   :  { %p581_p6 = por %p580_p5, %p579_p4 }
   0xd   :  { %p582_p7 = pnand %p581_p6, %p575_p3 }
   0xf   :  { %585 = shalt.err (!%p582_p7)
}
  0x10   :  { %s613_s28 = smov 64   ;;  %s614_s29 = smov 4  }
  0x11   :  { %29 = dma.hbm_to_vmem [thread:$0]  %s722_s3, 3072, %s24_s19, [#allocation3], %s613_s28, %s613_s28, %s614_s29  }
  0x12   :  { %608 = dma.done.wait [#allocation3], 3072  }
  0x13   :  { %609 = vsyncadd [#allocation3], 4294964224  ;;  %v615_v0 = vmov 0.0   ;;  %vm616_vm0 = vmmov 0   ;;  %v617_v1 = vmov 0   ;;  %v544_v2 = vld [vmem:[#allocation2 + $0x10] sm:$0xff]   ;;  %v169_v27 = vlaneseq }
  0x14   :  { %480 = vmatprep.subr.bf16.mxu0 %v615_v0  ;;  %488 = vmatprep.subr.bf16.mxu1 %v615_v0  ;;  %v545_v3 = vld [vmem:[#allocation2] sm:$0xff]   ;;  %v546_v4 = vld [vmem:[#allocation2 + $0x18] sm:$0xff]   ;;  %v547_v5 = vld [vmem:[#allocation2 + $0x8] sm:$0xff]   ;;  %vm60_vm1 = vcmask 261120   ;;  %s618_s15 = smov [#allocation5]  }
  0x15   :  { %484 = vmatprep.mubr.msk.bf16.mxu0 %vm616_vm0, %v615_v0  ;;  %492 = vmatprep.mubr.msk.bf16.mxu1 %vm616_vm0, %v615_v0  ;;  %v38_v6 = vld [vmem:[%s720_s1] sm:$0xff]  ;;  %v549_v14 = vld [vmem:[#allocation2 + $0x48] sm:$0xff]   ;;  %v550_v15 = vld [vmem:[#allocation2 + $0x50] sm:$0xff]   ;;  %v170_v28 = vshrl.u32 %v169_v27, 7  ;;  %s420_s16 = sshll.u32 %s618_s15, 4  ;;  %s421_s16 = int_to_ptr.vmem [resolvable:$true] %s420_s16 }
  0x16   :  { %543 = vset.pattern.permute.xlu0 %v617_v1  ;;  %481 = vmatpush3.bf16.msra.mxu0 %v544_v2  ;;  %v36_v7 = vld [vmem:[%s719_s0] sm:$0xff]  ;;  %v39_v9 = vpack.c.bf16 %v38_v6, %v38_v6  ;;  %v551_v16 = vld [vmem:[#allocation2 + $0x58] sm:$0xff]   ;;  %v553_v18 = vld [vmem:[#allocation2 + $0x68] sm:$0xff]   ;;  %s586_s17 = scalar_lea.vmem %s421_s16, 128  ;;  %p591_p9 = scmp.lt.s32.totalorder %s421_s16, %s421_s16 }
  0x17   :  { %489 = vmatpush3.bf16.msra.mxu1 %v545_v3  ;;  %482 = vmatprep.subr.bf16.mxu0 %v615_v0  ;;  %v159_v8 = vld [vmem:[%s721_s2] sm:$0xff]  ;;  %v37_v11 = vpack.c.bf16 %v36_v7, %v36_v7  ;;  %v554_v19 = vld [vmem:[#allocation2 + $0x70] sm:$0xff]   ;;  %v555_v20 = vld [vmem:[#allocation2 + $0x78] sm:$0xff]   ;;  %v171_v31 = vsub.s32 0, %v170_v28  ;;  %p587_p8 = scmp.ne.s32.totalorder %s421_s16, %s586_s17  ;;  %p592_p10 = scmp.lt.s32.totalorder %s586_s17, %s586_s17 }
  0x18   :  { %490 = vmatprep.subr.bf16.mxu1 %v615_v0  ;;  %v160_v10 = vpack.c.bf16 %v159_v8, %v159_v8  ;;  %v548_v12 = vld [vmem:[#allocation2 + $0x40] sm:$0xff]   ;;  %v557_v22 = vld [vmem:[#allocation2 + $0x88] sm:$0xff]   ;;  %v558_v23 = vld [vmem:[#allocation2 + $0x90] sm:$0xff]  }
  0x19   :  { %v552_v17 = vld [vmem:[#allocation2 + $0x60] sm:$0xff]   ;;  %v559_v24 = vld [vmem:[#allocation2 + $0x98] sm:$0xff]   ;;  %v561_v26 = vld [vmem:[#allocation2 + $0xa8] sm:$0xff]   ;;  %p593_p11 = por %p592_p10, %p591_p9 }
  0x1a   :  { %483 = vmatpush3.bf16.msra.mxu0 %v546_v4  ;;  %v161_v13 = vunpack.c.l.bf16 %v160_v10  ;;  %v556_v21 = vld [vmem:[#allocation2 + $0x80] sm:$0xff]   ;;  %v562_v49 = vld [vmem:[#allocation2 + $0xb0] sm:$0xff]   ;;  %v563_v50 = vld [vmem:[#allocation2 + $0xb8] sm:$0xff]  }
  0x1b   :  { %491 = vmatpush3.bf16.msra.mxu1 %v547_v5  ;;  %496 = vmatprep.subr.bf16.mxu0 %v615_v0  ;;  %v560_v25 = vld [vmem:[#allocation2 + $0xa0] sm:$0xff]   ;;  %p594_p12 = pnand %p593_p11, %p587_p8 }
  0x1c   :  { %516 = vmatprep.subr.bf16.mxu1 %v615_v0  ;;  %166 = vperm.xlu0 %543, %v161_v13   ;;  %v162_v29 = vld [vmem:[#allocation2 + $0x20] sm:$0x1]  ;;  %v437_v51 = vld [vmem:[%s723_s4 + $0x1] ss:$0 sm:$0xff]  ;;  %v447_v59 = vld [vmem:[%s723_s4 + $0x2] ss:$0 sm:$0xff] }
  0x1d   :  { %485 = vmatmul.mubr.msk.bf16.vlgmr.msra.gmra.mrb[0].mxu0 %vm60_vm1, %v39_v9  ;;  %v163_v30 = vunpack.c.l.bf16 %v162_v29  ;;  %v435_v41 = vld [vmem:[%s723_s4] ss:$0 sm:$0xff] }
  0x1e   :  { %493 = vmatmul.mubr.msk.bf16.vlgmr.msra.gmra.mrb[0].mxu1 %vm60_vm1, %v37_v11  ;;  %497 = vmatpush3.bf16.msra.mxu0 %v548_v12 }
  0x1f   :  { %498 = vmatprep.subr.bf16.mxu0 %v615_v0  ;;  %512 = vmatprep.mubr.msk.bf16.mxu0 %vm616_vm0, %v615_v0  ;;  %v172_v32 = vrot.slane %v163_v30, %v171_v31 }
  0x20   :  { %532 = vmatprep.mubr.msk.bf16.mxu1 %vm616_vm0, %v615_v0  ;;  %517 = vmatpush3.bf16.msra.mxu1 %v556_v21 }
  0x21   :  { %518 = vmatprep.subr.bf16.mxu1 %v615_v0 }
  0x22   :  { %499 = vmatpush3.bf16.msra.mxu0 %v549_v14 }
  0x23   :  { %500 = vmatprep.subr.bf16.mxu0 %v615_v0 }
  0x24   :  { %519 = vmatpush3.bf16.msra.mxu1 %v557_v22 }
  0x25   :  { %520 = vmatprep.subr.bf16.mxu1 %v615_v0 }
  0x26   :  { %501 = vmatpush3.bf16.msra.mxu0 %v550_v15 }
  0x27   :  { %502 = vmatprep.subr.bf16.mxu0 %v615_v0 }
  0x28   :  { %521 = vmatpush3.bf16.msra.mxu1 %v558_v23 }
  0x29   :  { %522 = vmatprep.subr.bf16.mxu1 %v615_v0 }
  0x2a   :  { %503 = vmatpush3.bf16.msra.mxu0 %v551_v16 }
  0x2b   :  { %504 = vmatprep.subr.bf16.mxu0 %v615_v0 }
  0x2c   :  { %523 = vmatpush3.bf16.msra.mxu1 %v559_v24 }
  0x2d   :  { %524 = vmatprep.subr.bf16.mxu1 %v615_v0 }
  0x2e   :  { %505 = vmatpush3.bf16.msra.mxu0 %v552_v17 }
  0x2f   :  { %506 = vmatprep.subr.bf16.mxu0 %v615_v0 }
  0x30   :  { %525 = vmatpush3.bf16.msra.mxu1 %v560_v25 }
  0x31   :  { %526 = vmatprep.subr.bf16.mxu1 %v615_v0 }
  0x32   :  { %507 = vmatpush3.bf16.msra.mxu0 %v553_v18 }
  0x33   :  { %508 = vmatprep.subr.bf16.mxu0 %v615_v0 }
  0x34   :  { %527 = vmatpush3.bf16.msra.mxu1 %v561_v26 }
  0x35   :  { %528 = vmatprep.subr.bf16.mxu1 %v615_v0 }
  0x36   :  { %509 = vmatpush3.bf16.msra.mxu0 %v554_v19 }
  0x37   :  { %510 = vmatprep.subr.bf16.mxu0 %v615_v0 }
  0x38   :  { %529 = vmatpush3.bf16.msra.mxu1 %v562_v49 }
  0x39   :  { %530 = vmatprep.subr.bf16.mxu1 %v615_v0 }
  0x3a   :  { %511 = vmatpush3.bf16.msra.mxu0 %v555_v20 }
  0x3c   :  { %531 = vmatpush3.bf16.msra.mxu1 %v563_v50 }
  0x9b   :  { %v167_v33 = vpop.permute.xlu0 %166 }
  0x9c   :  { %v173_v34 = vmul.f32 %v172_v32, %v167_v33 }
  0xf0   :  { %v98_v35 = vpop.f32.mrb[0].mxu0 }
  0xf1   :  { %v153_v36 = vpop.f32.mrb[0].mxu1  ;;  %v486_v37 = vpop.f32.mrb[1].mxu0 }
  0xf2   :  { %v154_v38 = vadd.f32 %v153_v36, %v98_v35  ;;  %v494_v39 = vpop.f32.mrb[1].mxu1  ;;  %v101_v40 = vpop.f32.mrb[2].mxu0 }
  0xf3   :  { %v156_v42 = vpop.f32.mrb[2].mxu1  ;;  %v487_v43 = vpop.f32.mrb[3].mxu0 }
  0xf4   :  { %v174_v44 = vadd.f32 %v173_v34, %v154_v38  ;;  %v495_v45 = vpop.f32.mrb[3].mxu1 }
  0xf6   :  { %v182_v46 = vadd.f32 %v435_v41, %v174_v44 }
  0xf8   :  { %v183_v47 = vmax.f32 %v182_v46, 0.0 }
  0xfa   :  { %v184_v48 = vpack.c.bf16 %v183_v47, %v183_v47 }
  0xfc   :  { %513 = vmatmul.mubr.bf16.vlgmr.msra.gmra.mrb[4].mxu0 %v184_v48 }
 0x1cf   :  { %v292_v52 = vpop.f32.mrb[4].mxu0 }
 0x1d0   :  { %v293_v53 = vadd.f32 %v437_v51, %v292_v52  ;;  %v514_v54 = vpop.f32.mrb[5].mxu0 }
 0x1d1   :  { %v295_v55 = vpop.f32.mrb[6].mxu0 }
 0x1d2   :  { %v298_v56 = vmax.f32 %v293_v53, 0.0  ;;  %v515_v57 = vpop.f32.mrb[7].mxu0 }
 0x1d4   :  { %v299_v58 = vpack.c.bf16 %v298_v56, %v298_v56 }
 0x1d6   :  { %533 = vmatmul.mubr.bf16.vlgmr.msra.gmra.mrb[4].mxu1 %v299_v58 }
 0x2a9   :  { %v407_v60 = vpop.f32.mrb[4].mxu1 }
 0x2aa   :  { %v408_v61 = vadd.f32 %v447_v59, %v407_v60  ;;  %v534_v62 = vpop.f32.mrb[5].mxu1 }
 0x2ab   :  { %v410_v63 = vpop.f32.mrb[6].mxu1 }
 0x2ac   :  { %413 = vst [vmem:[#allocation5] sm:$0xff] %v408_v61  ;;  %v535_v0 = vpop.f32.mrb[7].mxu1 }
 0x2ad   :  { %597 = shalt.err (!%p594_p12)
}
 0x2ae   :  { %s598_s4 = scalar_lea.hbm %s724_s5, 128 }
 0x2af   :  { %p599_p13 = scmp.ne.s32.totalorder %s724_s5, %s598_s4  ;;  %p602_p0 = scmp.lt.u32.totalorder %s598_s4, %s724_s5 }
 0x2b1   :  { %p604_p1 = pnand %p602_p0, %p599_p13 }
 0x2b3   :  { %607 = shalt.err (!%p604_p1)
}
 0x2b4   :  { %423 = dma.vmem_to_hbm [thread:$0]  %s421_s16, 128, %s724_s5, [#allocation4]  }
 0x2b5   :  { %610 = dma.done.wait [#allocation4], 128  }
 0x2b6   :  { %611 = vsyncadd [#allocation4], 4294967168 }
 0x2b7   :  { %427 = vsyncpa [#allocation3], 1 }
 0x2b8   :  { %428 = vsyncpa [#allocation4], 1 }

</bundles_post_ra>
